<compile_context>
chip_gen: v5e
topology: v5e:2x2
jax: 0.10.0
libtpu: 0.0.40
codegen_flags: <defaults>
</compile_context>

<pallas_src>
import functools
import math

import jax
import jax.numpy as jnp
import numpy as np
from jax.experimental import pallas as pl
from jax.experimental.pallas import tpu as pltpu

_LANE = 128


def _pick_chunk_rows(tile_rows, L, C):
    """Sublane-rows per inner-loop step: keep the live f32 chunk ~<= 8-16 vregs."""
    if tile_rows <= 8:
        return tile_rows
    for ch in (32, 16, 8):
        if tile_rows % ch == 0 and L * C * ch <= 64:
            return ch
    return 8  # tile_rows is always a multiple of 8 here


def _vmem_budget_bytes():
    """Generation-aware budget for the double-buffered block footprint."""
    try:
        cap = int(pltpu.get_tpu_info().vmem_capacity_bytes)
    except Exception:
        cap = 64 << 20  # conservative fallback (v7x per-TC VMEM)
    return min(24 << 20, cap // 3)


def _atten_fusion_kernel(x_ref, o_ref, *, chunk_rows):
    # x_ref: (L, C, TR, 128)   o_ref: (C, TR, 128)
    L, C, TR, _ = x_ref.shape
    scale = 1.0 / math.sqrt(float(C))
    n_chunks = TR // chunk_rows

    def compute(xc):
        # Per-chunk upcast only: bf16 blocks stay packed in VMEM, and f32 is
        # mandatory for exp on v5e (no bf16 VPU/EUP) anyway.
        xc = xc.astype(jnp.float32)                        # (L, C, ch, 128)
        # scores[j, s, n] = <x[0, :, s, n], x[j, :, s, n]> / sqrt(C)
        scores = jnp.sum(xc[0:1] * xc, axis=1) * scale     # (L, ch, 128)
        # softmax over the L (key) axis, per lane -> exact (kernel is HBM-bound)
        m = jnp.max(scores, axis=0, keepdims=True)         # (1, ch, 128)
        e = jnp.exp(scores - m)                            # (L, ch, 128)
        denom = jnp.sum(e, axis=0, keepdims=True)          # (1, ch, 128)
        attn = e / denom                                   # (L, ch, 128)
        # context row 0: out[c, s, n] = sum_j attn[j, s, n] * x[j, c, s, n]
        return jnp.sum(attn[:, None, :, :] * xc, axis=0)   # (C, ch, 128)

    if n_chunks == 1:
        o_ref[...] = compute(x_ref[...]).astype(o_ref.dtype)
    else:
        @pl.loop(0, n_chunks)
        def _(ci):
            s0 = pl.multiple_of(ci * chunk_rows, chunk_rows)
            xc = x_ref[:, :, pl.ds(s0, chunk_rows), :]
            o_ref[:, pl.ds(s0, chunk_rows), :] = compute(xc).astype(o_ref.dtype)


def atten_fusion(x, *, max_tile_rows=512):
    """x: (cav_num, C, H, W) float array. Returns (C, H, W)."""
    L, C, H, W = x.shape
    N = H * W
    dtype = x.dtype
    itemsize = jnp.dtype(dtype).itemsize

    rows = pl.cdiv(N, _LANE)  # spatial rows of 128 lanes

    # --- pick the spatial tile (in sublane rows of 128 lanes) -------------
    # Double-buffered per-row footprint: 2 copies of (input L*C + output C).
    bytes_per_row = 2 * (L * C + C) * itemsize * _LANE
    budget = _vmem_budget_bytes()
    cap_rows = max(8, int(budget // bytes_per_row) // 8 * 8)
    tile_rows = min(max_tile_rows, cap_rows)
    if rows >= 16:
        # Keep >= 2 grid blocks so the "parallel" axis can use both
        # TensorCores on v7x (megacore sharding elsewhere).
        half = ((pl.cdiv(rows, 2) + 7) // 8) * 8
        tile_rows = min(tile_rows, half)
    tile_rows = max(8, (tile_rows // 8) * 8)   # keep (8,128) divisibility
    if rows <= tile_rows:
        tile_rows = rows                       # single full-extent block
    grid = (pl.cdiv(rows, tile_rows),)         # partial last block handled by Pallas

    # --- layout: (L, C, rows, 128); pad only to the next lane multiple ----
    x_r = x.reshape(L, C, N)
    n128 = rows * _LANE
    if n128 != N:
        x_r = jnp.pad(x_r, ((0, 0), (0, 0), (0, n128 - N)))
    x_r = x_r.reshape(L, C, rows, _LANE)

    chunk_rows = _pick_chunk_rows(tile_rows, L, C)
    footprint = bytes_per_row * tile_rows
    vmem_limit = int(max(16 << 20, min(footprint + (8 << 20), 48 << 20)))

    kernel = functools.partial(_atten_fusion_kernel, chunk_rows=chunk_rows)

    out = pl.pallas_call(
        kernel,
        out_shape=jax.ShapeDtypeStruct((C, rows, _LANE), dtype),
        grid_spec=pl.GridSpec(
            grid=grid,
            in_specs=[pl.BlockSpec((L, C, tile_rows, _LANE),
                                   lambda i: (0, 0, i, 0))],
            out_specs=pl.BlockSpec((C, tile_rows, _LANE),
                                   lambda i: (0, i, 0)),
        ),
        compiler_params=pltpu.CompilerParams(
            dimension_semantics=("parallel",),
            vmem_limit_bytes=vmem_limit,
        ),
    )(x_r)

    return out.reshape(C, n128)[:, :N].reshape(C, H, W)


def atten_fusion_ref(x):
    """Pure-JAX reference mirroring the PyTorch forward exactly."""
    L, C, H, W = x.shape
    xr = x.reshape(L, C, -1).transpose(2, 0, 1)  # (N, L, C)
    score = jnp.einsum("nld,nmd->nlm", xr, xr) / math.sqrt(float(C))
    attn = jax.nn.softmax(score, axis=-1)
    ctx = jnp.einsum("nlm,nmd->nld", attn, xr)   # (N, L, C)
    out = ctx.transpose(1, 2, 0).reshape(L, C, H, W)[0]
    return out


if __name__ == "__main__":
    key = jax.random.PRNGKey(0)

    # Primary case: matches the module's typical small shapes (single block).
    cav_num, C, H, W = 2, 4, 16, 16
    x = jax.random.normal(key, (cav_num, C, H, W), dtype=jnp.float32)
    out = jax.block_until_ready(atten_fusion(x))
    ref = atten_fusion_ref(x)
    np.testing.assert_allclose(np.asarray(out), np.asarray(ref),
                               rtol=1e-4, atol=1e-5)

    # Non-multiple-of-128 spatial size: exercises the 128-lane padding path.
    x2 = jax.random.normal(jax.random.PRNGKey(1), (3, 4, 20, 25),
                           dtype=jnp.float32)
    out2 = jax.block_until_ready(atten_fusion(x2))
    ref2 = atten_fusion_ref(x2)
    np.testing.assert_allclose(np.asarray(out2), np.asarray(ref2),
                               rtol=1e-4, atol=1e-5)

    # Larger case: multi-block grid (>=2 for dual-TC), partial last block,
    # and the in-kernel chunked inner loop.
    x3 = jax.random.normal(jax.random.PRNGKey(2), (2, 4, 64, 80),
                           dtype=jnp.float32)
    out3 = jax.block_until_ready(atten_fusion(x3))
    ref3 = atten_fusion_ref(x3)
    np.testing.assert_allclose(np.asarray(out3), np.asarray(ref3),
                               rtol=1e-4, atol=1e-5)

    print("KERNEL_OK")
</pallas_src>

<mosaic_0001>
module attributes {stable_mosaic.version = 11 : i64} {
  func.func @_atten_fusion_kernel(%arg0: i32, %arg1: memref<2x4x2x128xf32, #tpu.memory_space<vmem>>, %arg2: memref<4x2x128xf32, #tpu.memory_space<vmem>>) attributes {dimension_semantics = [#tpu.dimension_semantics<parallel>], iteration_bounds = array<i64: 1>, scalar_prefetch = 0 : i64, scratch_operands = 0 : i64, tpu.core_type = #tpu.core_type<tc>, window_params = [{transform_indices = @transform_0, window_bounds = array<i64: 2, 4, 2, 128>}, {transform_indices = @transform_1, window_bounds = array<i64: 4, 2, 128>}]} {
    %c0 = arith.constant 0 : index
    %c0_0 = arith.constant 0 : index
    %c0_1 = arith.constant 0 : index
    %c0_2 = arith.constant 0 : index
    %0 = vector.load %arg1[%c0, %c0_0, %c0_1, %c0_2] : memref<2x4x2x128xf32, #tpu.memory_space<vmem>>, vector<2x4x2x128xf32>
    %1 = vector.extract_strided_slice %0 {offsets = [0, 0, 0, 0], sizes = [1, 4, 2, 128], strides = [1, 1, 1, 1]} : vector<2x4x2x128xf32> to vector<1x4x2x128xf32>
    %2 = vector.broadcast %1 : vector<1x4x2x128xf32> to vector<2x4x2x128xf32>
    %3 = arith.mulf %2, %0 : vector<2x4x2x128xf32>
    %cst = arith.constant dense<0.000000e+00> : vector<2x2x128xf32>
    %4 = vector.multi_reduction <add>, %3, %cst [1] : vector<2x4x2x128xf32> to vector<2x2x128xf32>
    %cst_3 = arith.constant 5.000000e-01 : f32
    %5 = vector.broadcast %cst_3 : f32 to vector<2x2x128xf32>
    %6 = arith.mulf %4, %5 : vector<2x2x128xf32>
    %cst_4 = arith.constant dense<0xFF800000> : vector<2x128xf32>
    %7 = vector.multi_reduction <maximumf>, %6, %cst_4 [0] : vector<2x2x128xf32> to vector<2x128xf32>
    %8 = vector.shape_cast %7 : vector<2x128xf32> to vector<1x2x128xf32>
    %9 = vector.broadcast %8 : vector<1x2x128xf32> to vector<2x2x128xf32>
    %10 = arith.subf %6, %9 : vector<2x2x128xf32>
    %11 = math.exp %10 : vector<2x2x128xf32>
    %cst_5 = arith.constant dense<0.000000e+00> : vector<2x128xf32>
    %12 = vector.multi_reduction <add>, %11, %cst_5 [0] : vector<2x2x128xf32> to vector<2x128xf32>
    %13 = vector.shape_cast %12 : vector<2x128xf32> to vector<1x2x128xf32>
    %14 = vector.broadcast %13 : vector<1x2x128xf32> to vector<2x2x128xf32>
    %15 = arith.divf %11, %14 : vector<2x2x128xf32>
    %16 = vector.shape_cast %15 : vector<2x2x128xf32> to vector<2x1x2x128xf32>
    %17 = vector.broadcast %16 : vector<2x1x2x128xf32> to vector<2x4x2x128xf32>
    %18 = arith.mulf %17, %0 : vector<2x4x2x128xf32>
    %cst_6 = arith.constant dense<0.000000e+00> : vector<4x2x128xf32>
    %19 = vector.multi_reduction <add>, %18, %cst_6 [0] : vector<2x4x2x128xf32> to vector<4x2x128xf32>
    %c0_7 = arith.constant 0 : index
    %c0_8 = arith.constant 0 : index
    %c0_9 = arith.constant 0 : index
    %20 = vector.load %arg2[%c0_7, %c0_8, %c0_9] : memref<4x2x128xf32, #tpu.memory_space<vmem>>, vector<4x2x128xf32>
    tpu.vector_store %arg2[%c0_7, %c0_8, %c0_9], %19 {strides = array<i32>} : memref<4x2x128xf32, #tpu.memory_space<vmem>>, vector<4x2x128xf32>,
    return
  }
  func.func @transform_0(%arg0: i32) -> (i32, i32, i32, i32) {
    %c0_i32 = arith.constant 0 : i32
    %c0_i32_0 = arith.constant 0 : i32
    %c0_i32_1 = arith.constant 0 : i32
    %c0_i32_2 = arith.constant 0 : i32
    return %c0_i32, %c0_i32_0, %arg0, %c0_i32_1 : i32, i32, i32, i32
  }
  func.func @transform_1(%arg0: i32) -> (i32, i32, i32) {
    %c0_i32 = arith.constant 0 : i32
    %c0_i32_0 = arith.constant 0 : i32
    %c0_i32_1 = arith.constant 0 : i32
    return %c0_i32, %arg0, %c0_i32_0 : i32, i32, i32
  }
}

</mosaic_0001>

<bundles_post_ra>
// kernel: tpu_custom_call.1
= control target key start
LH: loop header
LB: loop body
LE: loop exit
PB: predicated region body
PF: predicated region fallthrough
CT: control target
= control target key end

     0   :  { %6 = vsyncpa [#allocation3], 0  ;;  %s261_s0 = inlined_call_operand.hbm [shape: f32[2,4,2,128], index: 0, kind: input, shape index: {}]   ;;  %s262_s1 = inlined_call_operand.hbm [shape: f32[4,2,128], index: 1, kind: output, shape index: {}]  }
   0x1   :  { %7 = vsyncpa [#allocation4], 0  ;;  %s12_s8 = sshll.u32 %s261_s0, 4  ;;  %s191_s9 = smov [#allocation2]   ;;  %s13_s8 = int_to_ptr.hbm [resolvable:$true] %s12_s8 }
   0x2   :  { %s14_s10 = sshll.u32 %s191_s9, 4  ;;  %s192_s11 = smov 32   ;;  %s15_s10 = int_to_ptr.vmem [resolvable:$true] %s14_s10 }
   0x3   :  { %s193_s12 = smov 2  }
   0x4   :  { %20 = dma.hbm_to_vmem [thread:$0]  %s13_s8, 256, %s15_s10, [#allocation3], %s192_s11, %s192_s11, %s193_s12  }
   0x5   :  { %187 = dma.done.wait [#allocation3], 256  }
   0x6   :  { %188 = vsyncadd [#allocation3], 4294967040  ;;  %vm41_vm0 = vcmask 1041408   ;;  %v211_v0 = vld [vmem:[#allocation2] sm:$0x3]  ;;  %s194_s0 = smov [#allocation5]  }
   0x7   :  { %v213_v1 = vld [vmem:[#allocation2 + $0x2] sm:$0x3]  ;;  %v215_v2 = vld [vmem:[#allocation2 + $0x4] sm:$0x3]  ;;  %v217_v3 = vld [vmem:[#allocation2 + $0x6] sm:$0x3]  ;;  %v33_v6 = vmul.f32 %v211_v0, %v211_v0 }
   0x8   :  { %v29_v4 = vld [vmem:[#allocation2 + $0x8] sm:$0x3]  ;;  %v30_v5 = vld [vmem:[#allocation2 + $0xa] sm:$0x3]  ;;  %v34_v7 = vmul.f32 %v213_v1, %v213_v1  ;;  %v35_v8 = vmul.f32 %v215_v2, %v215_v2  ;;  %v31_v9 = vld [vmem:[#allocation2 + $0xc] sm:$0x3]  ;;  %v36_v11 = vmul.f32 %v217_v3, %v217_v3 }
   0x9   :  { %v32_v10 = vld [vmem:[#allocation2 + $0xe] sm:$0x3]  ;;  %v37_v12 = vmul.f32 %v29_v4, %v211_v0  ;;  %v38_v13 = vmul.f32 %v30_v5, %v213_v1  ;;  %v39_v14 = vmul.f32 %v31_v9, %v215_v2  ;;  %v42_v16 = vsel %vm41_vm0, %v33_v6, 0.0  ;;  %s114_s13 = sshll.u32 %s194_s0, 4  ;;  %s116_s16 = sshll.u32 %s262_s1, 4  ;;  %s115_s13 = int_to_ptr.vmem [resolvable:$true] %s114_s13  ;;  %s117_s16 = int_to_ptr.hbm [resolvable:$true] %s116_s16 }
   0xa   :  { %v40_v15 = vmul.f32 %v32_v10, %v217_v3  ;;  %v43_v17 = vsel %vm41_vm0, %v34_v7, 0.0  ;;  %v45_v19 = vsel %vm41_vm0, %v35_v8, 0.0  ;;  %v47_v21 = vsel %vm41_vm0, %v36_v11, 0.0 }
   0xb   :  { %v44_v18 = vadd.f32 %v43_v17, %v42_v16  ;;  %v49_v20 = vsel %vm41_vm0, %v37_v12, 0.0  ;;  %v50_v22 = vsel %vm41_vm0, %v38_v13, 0.0  ;;  %v52_v23 = vsel %vm41_vm0, %v39_v14, 0.0 }
   0xc   :  { %v51_v25 = vadd.f32 %v50_v22, %v49_v20  ;;  %v54_v26 = vsel %vm41_vm0, %v40_v15, 0.0 }
   0xd   :  { %v46_v24 = vadd.f32 %v45_v19, %v44_v18 }
   0xe   :  { %v53_v28 = vadd.f32 %v52_v23, %v51_v25 }
   0xf   :  { %v48_v27 = vadd.f32 %v47_v21, %v46_v24 }
  0x10   :  { %v55_v29 = vadd.f32 %v54_v26, %v53_v28 }
  0x11   :  { %v56_v30 = vmul.f32 0.5, %v48_v27 }
  0x12   :  { %v57_v31 = vmul.f32 0.5, %v55_v29 }
  0x13   :  { %v58_v32 = vsel %vm41_vm0, %v56_v30, -inf }
  0x14   :  { %v59_v33 = vsel %vm41_vm0, %v57_v31, -inf }
  0x15   :  { %v60_v34 = vmax.f32 %v58_v32, %v59_v33 }
  0x17   :  { %v61_v35 = vsub.f32 %v56_v30, %v60_v34  ;;  %v62_v36 = vsub.f32 %v57_v31, %v60_v34 }
  0x19   :  { %v63_v37 = vmul.f32 1.442695, %v61_v35  ;;  %v65_v38 = vmul.f32 1.442695, %v62_v36 }
  0x1b   :  { %133 = vpow2.f32 %v63_v37 }
  0x1c   :  { %135 = vpow2.f32 %v65_v38 }
  0x21   :  { %v134_v39 = vpop.eup %133 }
  0x22   :  { %v136_v40 = vpop.eup %135  ;;  %v67_v41 = vsel %vm41_vm0, %v134_v39, 0.0 }
  0x23   :  { %v68_v42 = vsel %vm41_vm0, %v136_v40, 0.0 }
  0x24   :  { %v69_v43 = vadd.f32 %v68_v42, %v67_v41 }
  0x26   :  { %137 = vrcp.f32 %v69_v43  ;;  %v81_v46 = vand.u32 2147483648, %v69_v43  ;;  %vm75_vm1 = vweird.f32 %v69_v43  ;;  %v79_v48 = vand.u32 2147483647, %v69_v43 }
  0x28   :  { %v82_v50 = vor.u32 1.1754944e-38, %v81_v46  ;;  %vm80_vm4 = vcmp.eq.f32.partialorder %v79_v48, 8.507059e+37 }
  0x2c   :  { %v138_v44 = vpop.eup %137 }
  0x2d   :  { %v71_v45 = vmul.f32 %v138_v44, %v69_v43  ;;  %vm76_vm2 = vweird.f32 %v138_v44 }
  0x2e   :  { %vm77_vm3 = vmor %vm75_vm1, %vm76_vm2 }
  0x2f   :  { %v72_v47 = vsub.f32 1.0, %v71_v45 }
  0x31   :  { %v73_v49 = vmul.f32 %v138_v44, %v72_v47 }
  0x33   :  { %v74_v51 = vadd.f32 %v138_v44, %v73_v49 }
  0x35   :  { %v78_v52 = vsel %vm77_vm3, %v138_v44, %v74_v51 }
  0x36   :  { %v83_v53 = vsel %vm80_vm4, %v82_v50, %v78_v52 }
  0x37   :  { %v84_v54 = vmul.f32 %v134_v39, %v83_v53  ;;  %v85_v55 = vmul.f32 %v136_v40, %v83_v53 }
  0x39   :  { %v86_v56 = vmul.f32 %v84_v54, %v211_v0  ;;  %v90_v57 = vmul.f32 %v85_v55, %v29_v4  ;;  %v87_v58 = vmul.f32 %v84_v54, %v213_v1  ;;  %v91_v59 = vmul.f32 %v85_v55, %v30_v5 }
  0x3a   :  { %v88_v60 = vmul.f32 %v84_v54, %v215_v2  ;;  %v92_v61 = vmul.f32 %v85_v55, %v31_v9  ;;  %v89_v62 = vmul.f32 %v84_v54, %v217_v3  ;;  %v93_v63 = vmul.f32 %v85_v55, %v32_v10 }
  0x3b   :  { %v94_v6 = vsel %vm41_vm0, %v86_v56, 0.0  ;;  %v95_v7 = vsel %vm41_vm0, %v90_v57, 0.0  ;;  %v97_v8 = vsel %vm41_vm0, %v87_v58, 0.0  ;;  %v98_v11 = vsel %vm41_vm0, %v91_v59, 0.0 }
  0x3c   :  { %v96_v12 = vadd.f32 %v95_v7, %v94_v6  ;;  %v99_v0 = vadd.f32 %v98_v11, %v97_v8  ;;  %v100_v4 = vsel %vm41_vm0, %v88_v60, 0.0  ;;  %v101_v1 = vsel %vm41_vm0, %v92_v61, 0.0 }
  0x3d   :  { %v102_v2 = vadd.f32 %v101_v1, %v100_v4  ;;  %v103_v3 = vsel %vm41_vm0, %v89_v62, 0.0  ;;  %v104_v5 = vsel %vm41_vm0, %v93_v63, 0.0 }
  0x3e   :  { %106 = vst [vmem:[#allocation5] sm:$0x3] %v96_v12  ;;  %v105_v9 = vadd.f32 %v104_v5, %v103_v3 }
  0x3f   :  { %107 = vst [vmem:[#allocation5 + $0x2] sm:$0x3] %v99_v0 }
  0x40   :  { %108 = vst [vmem:[#allocation5 + $0x4] sm:$0x3] %v102_v2 }
  0x41   :  { %109 = vst [vmem:[#allocation5 + $0x6] sm:$0x3] %v105_v9 }
  0x42   :  { %122 = dma.vmem_to_hbm [thread:$0]  %s115_s13, 128, %s117_s16, [#allocation4], %s192_s11, %s192_s11, %s193_s12  }
  0x43   :  { %189 = dma.done.wait [#allocation4], 128  }
  0x44   :  { %190 = vsyncadd [#allocation4], 4294967168 }
  0x45   :  { %127 = vsyncpa [#allocation3], 1 }
  0x46   :  { %128 = vsyncpa [#allocation4], 1 }

</bundles_post_ra>
